<compile_context>
chip_gen: v7x
topology: tpu7x:2x2x1
jax: 0.10.0
libtpu: 0.0.40
codegen_flags: <defaults>
</compile_context>

<pallas_src>
import functools
import math

import jax
import jax.numpy as jnp
from jax.experimental import pallas as pl
from jax.experimental.pallas import tpu as pltpu


VMEM_LIMIT_BYTES = 64 * 1024 * 1024   # above the 16/32 MiB scoped defaults


def _pick_tile(dim, target, aligns):
    """Largest tile <= target that divides `dim` and is a multiple of one of
    `aligns` (preferred order); falls back to the full dim (always legal)."""
    if dim <= target:
        return dim
    for a in aligns:
        t = (target // a) * a
        while t >= a:
            if dim % t == 0:
                return t
            t -= a
    return dim


def _cparams(dim_sem):
    return pltpu.CompilerParams(dimension_semantics=dim_sem,
                                vmem_limit_bytes=VMEM_LIMIT_BYTES)


# ----------------------------------------------------------------------------
# Fused QKV projection: x (M,E) f32  x  wqkv (3,E,E) bf16  ->  (3,M,E) bf16.
# grid = (3, M/tm, K/tk); K is the reduction axis (last, "arbitrary").
# ----------------------------------------------------------------------------
def _qkv_kernel(x_ref, w_ref, b_ref, o_ref, acc_ref):
    k = pl.program_id(2)

    @pl.when(k == 0)
    def _():
        acc_ref[...] = jnp.zeros_like(acc_ref)

    acc_ref[...] += jnp.dot(x_ref[...].astype(jnp.bfloat16), w_ref[...],
                            preferred_element_type=jnp.float32)

    @pl.when(k == pl.num_programs(2) - 1)
    def _():
        o_ref[...] = (acc_ref[...] + b_ref[...]).astype(o_ref.dtype)


def qkv_projection(x, wqkv, bqkv, *, tm=512, tk=512):
    M, K = x.shape
    E = wqkv.shape[2]
    tm = _pick_tile(M, tm, (256, 8))
    tk = _pick_tile(K, tk, (256, 128))
    grid = (3, M // tm, K // tk)
    cost = pl.CostEstimate(flops=2 * M * 3 * E * K, transcendentals=0,
                           bytes_accessed=4 * M * K + 2 * 3 * K * E + 2 * 3 * M * E)
    return pl.pallas_call(
        _qkv_kernel,
        out_shape=jax.ShapeDtypeStruct((3, M, E), jnp.bfloat16),
        grid=grid,
        in_specs=[
            pl.BlockSpec((tm, tk), lambda j, i, k: (i, k)),
            pl.BlockSpec((None, tk, E), lambda j, i, k: (j, k, 0)),
            pl.BlockSpec((None, 1, E), lambda j, i, k: (j, 0, 0)),
        ],
        out_specs=pl.BlockSpec((None, tm, E), lambda j, i, k: (j, i, 0)),
        scratch_shapes=[pltpu.VMEM((tm, E), jnp.float32)],
        compiler_params=_cparams(("parallel", "parallel", "arbitrary")),
        cost_estimate=cost,
    )(x, wqkv, bqkv)


# ----------------------------------------------------------------------------
# Flash-style attention over the fused qkv array (3, B, S, E) bf16.
# grid = (B, q_tiles, kv_tiles); Q/K/V are selected purely via BlockSpec
# index_maps (leading block index 0/1/2) — no HBM slice copies.
# ----------------------------------------------------------------------------
def _flash_attn_kernel(q_ref, k_ref, v_ref, o_ref, m_sc, l_sc, acc_sc,
                       *, heads, scale):
    kv = pl.program_id(2)
    E = q_ref.shape[-1]
    D = E // heads

    @pl.when(kv == 0)
    def _():
        m_sc[...] = jnp.full_like(m_sc, -jnp.inf)
        l_sc[...] = jnp.zeros_like(l_sc)
        acc_sc[...] = jnp.zeros_like(acc_sc)

    q = q_ref[...]                                    # (tq, E) bf16
    k = k_ref[...]                                    # (tk, E) bf16
    v = v_ref[...]                                    # (tk, E) bf16

    for h in range(heads):                            # static unroll over heads
        lo = h * D
        qh = q[:, lo:lo + D]
        kh = k[:, lo:lo + D]
        vh = v[:, lo:lo + D]
        s = jax.lax.dot_general(qh, kh, (((1,), (1,)), ((), ())),
                                preferred_element_type=jnp.float32) * scale
        m_prev = m_sc[h]                              # (tq, 1) f32
        m_new = jnp.maximum(m_prev, jnp.max(s, axis=-1, keepdims=True))
        alpha = jnp.exp(m_prev - m_new)
        p = jnp.exp(s - m_new)                        # f32 softmax math
        l_sc[h] = alpha * l_sc[h] + jnp.sum(p, axis=-1, keepdims=True)
        acc_sc[h] = alpha * acc_sc[h] + jax.lax.dot_general(
            p.astype(jnp.bfloat16), vh, (((1,), (0,)), ((), ())),
            preferred_element_type=jnp.float32)
        m_sc[h] = m_new

    @pl.when(kv == pl.num_programs(2) - 1)
    def _():
        # assemble all heads and do ONE lane-dense (tq, E) store
        outs = [acc_sc[h] * pl.reciprocal(l_sc[h], approx=True)
                for h in range(heads)]
        o_ref[...] = jnp.concatenate(outs, axis=-1).astype(o_ref.dtype)


def flash_attention(qkv, heads, *, tq=512, tkv=512):
    _, B, S, E = qkv.shape
    D = E // heads
    tq = _pick_tile(S, tq, (256, 8))
    tkv = _pick_tile(S, tkv, (256, 8))
    scale = 1.0 / math.sqrt(D)
    grid = (B, S // tq, S // tkv)
    cost = pl.CostEstimate(flops=4 * B * S * S * E,
                           transcendentals=B * heads * S * S,
                           bytes_accessed=2 * 4 * B * S * E)
    return pl.pallas_call(
        functools.partial(_flash_attn_kernel, heads=heads, scale=scale),
        out_shape=jax.ShapeDtypeStruct((B, S, E), jnp.bfloat16),
        grid=grid,
        in_specs=[
            pl.BlockSpec((None, None, tq, E), lambda b, qi, ki: (0, b, qi, 0)),
            pl.BlockSpec((None, None, tkv, E), lambda b, qi, ki: (1, b, ki, 0)),
            pl.BlockSpec((None, None, tkv, E), lambda b, qi, ki: (2, b, ki, 0)),
        ],
        out_specs=pl.BlockSpec((None, tq, E), lambda b, qi, ki: (b, qi, 0)),
        scratch_shapes=[
            pltpu.VMEM((heads, tq, 1), jnp.float32),   # running max m
            pltpu.VMEM((heads, tq, 1), jnp.float32),   # running sum l
            pltpu.VMEM((heads, tq, D), jnp.float32),   # per-head accumulators
        ],
        compiler_params=_cparams(("parallel", "parallel", "arbitrary")),
        cost_estimate=cost,
    )(qkv, qkv, qkv)


# ----------------------------------------------------------------------------
# Fused: (x @ W + b) + residual  ->  LayerNorm.   (attention output projection)
# grid = (M/tm, K/tk); the LayerNorm epilogue needs the full N(=E) per row.
# ----------------------------------------------------------------------------
def _matmul_res_ln_kernel(x_ref, w_ref, b_ref, r_ref, g_ref, bt_ref,
                          o_ref, acc_ref, *, eps):
    k = pl.program_id(1)

    @pl.when(k == 0)
    def _():
        acc_ref[...] = jnp.zeros_like(acc_ref)

    acc_ref[...] += jnp.dot(x_ref[...].astype(jnp.bfloat16), w_ref[...],
                            preferred_element_type=jnp.float32)

    @pl.when(k == pl.num_programs(1) - 1)
    def _():
        y = acc_ref[...] + b_ref[...] + r_ref[...].astype(jnp.float32)
        mu = jnp.mean(y, axis=-1, keepdims=True)
        var = jnp.mean(jnp.square(y - mu), axis=-1, keepdims=True)
        yn = (y - mu) * jax.lax.rsqrt(var + eps)
        o_ref[...] = (yn * g_ref[...] + bt_ref[...]).astype(o_ref.dtype)


def matmul_residual_layernorm(x, w, b, res, gamma, beta, *, eps=1e-5,
                              tm=512, tk=512):
    M, K = x.shape
    N = w.shape[1]
    tm = _pick_tile(M, tm, (256, 8))
    tk = _pick_tile(K, tk, (256, 128))
    grid = (M // tm, K // tk)
    cost = pl.CostEstimate(flops=2 * M * N * K + 8 * M * N, transcendentals=0,
                           bytes_accessed=2 * M * K + 2 * K * N + 8 * M * N + 12 * N)
    return pl.pallas_call(
        functools.partial(_matmul_res_ln_kernel, eps=eps),
        out_shape=jax.ShapeDtypeStruct((M, N), jnp.float32),
        grid=grid,
        in_specs=[
            pl.BlockSpec((tm, tk), lambda i, k: (i, k)),
            pl.BlockSpec((tk, N), lambda i, k: (k, 0)),
            pl.BlockSpec((1, N), lambda i, k: (0, 0)),
            pl.BlockSpec((tm, N), lambda i, k: (i, 0)),
            pl.BlockSpec((1, N), lambda i, k: (0, 0)),
            pl.BlockSpec((1, N), lambda i, k: (0, 0)),
        ],
        out_specs=pl.BlockSpec((tm, N), lambda i, k: (i, 0)),
        scratch_shapes=[pltpu.VMEM((tm, N), jnp.float32)],
        compiler_params=_cparams(("parallel", "arbitrary")),
        cost_estimate=cost,
    )(x, w, b.reshape(1, N), res, gamma.reshape(1, N), beta.reshape(1, N))


# ----------------------------------------------------------------------------
# Fused FFN + residual + LayerNorm:
#   LayerNorm( relu(x @ W1 + b1) @ W2 + b2 + x )
# grid = (M/tm, H/th); the hidden dim is the reduction axis -> the (M, H)
# intermediate never leaves VMEM.  x doubles as the residual.
# ----------------------------------------------------------------------------
def _ffn_res_ln_kernel(x_ref, w1_ref, b1_ref, w2_ref, b2_ref, g_ref, bt_ref,
                       o_ref, acc_ref, *, eps):
    hi = pl.program_id(1)

    @pl.when(hi == 0)
    def _():
        acc_ref[...] = jnp.zeros_like(acc_ref)

    x16 = x_ref[...].astype(jnp.bfloat16)
    h = jnp.dot(x16, w1_ref[...],
                preferred_element_type=jnp.float32) + b1_ref[...]
    h = jnp.maximum(h, 0.0)
    acc_ref[...] += jnp.dot(h.astype(jnp.bfloat16), w2_ref[...],
                            preferred_element_type=jnp.float32)

    @pl.when(hi == pl.num_programs(1) - 1)
    def _():
        y = acc_ref[...] + b2_ref[...] + x_ref[...].astype(jnp.float32)
        mu = jnp.mean(y, axis=-1, keepdims=True)
        var = jnp.mean(jnp.square(y - mu), axis=-1, keepdims=True)
        yn = (y - mu) * jax.lax.rsqrt(var + eps)
        o_ref[...] = (yn * g_ref[...] + bt_ref[...]).astype(o_ref.dtype)


def ffn_residual_layernorm(x, w1, b1, w2, b2, gamma, beta, *, eps=1e-5,
                           tm=512, th=512):
    M, E = x.shape
    H = w1.shape[1]
    tm = _pick_tile(M, tm, (256, 8))
    th = _pick_tile(H, th, (256, 128))
    grid = (M // tm, H // th)
    cost = pl.CostEstimate(flops=4 * M * E * H + 8 * M * E, transcendentals=0,
                           bytes_accessed=8 * M * E + 2 * 2 * E * H + 4 * H + 12 * E)
    return pl.pallas_call(
        functools.partial(_ffn_res_ln_kernel, eps=eps),
        out_shape=jax.ShapeDtypeStruct((M, E), jnp.float32),
        grid=grid,
        in_specs=[
            pl.BlockSpec((tm, E), lambda i, h: (i, 0)),
            pl.BlockSpec((E, th), lambda i, h: (0, h)),
            pl.BlockSpec((1, th), lambda i, h: (0, h)),
            pl.BlockSpec((th, E), lambda i, h: (h, 0)),
            pl.BlockSpec((1, E), lambda i, h: (0, 0)),
            pl.BlockSpec((1, E), lambda i, h: (0, 0)),
            pl.BlockSpec((1, E), lambda i, h: (0, 0)),
        ],
        out_specs=pl.BlockSpec((tm, E), lambda i, h: (i, 0)),
        scratch_shapes=[pltpu.VMEM((tm, E), jnp.float32)],
        compiler_params=_cparams(("parallel", "arbitrary")),
        cost_estimate=cost,
    )(x, w1, b1.reshape(1, H), w2, b2.reshape(1, E),
      gamma.reshape(1, E), beta.reshape(1, E))


# ----------------------------------------------------------------------------
# Encoder forward (glue around the Pallas kernels)
# ----------------------------------------------------------------------------
def encoder_block_fwd(x, p, heads):
    """x: (B, S, E) f32 -> (B, S, E) f32."""
    B, S, E = x.shape
    xf = x.reshape(B * S, E)

    # fused Q|K|V projection, output shaped (3, M, E) so the attention kernel
    # can pick Q/K/V via index_map (no jnp slicing / HBM copies)
    qkv = qkv_projection(xf, p["wqkv"], p["bqkv"]).reshape(3, B, S, E)

    a = flash_attention(qkv, heads)                            # (B, S, E) bf16
    af = a.reshape(B * S, E)

    # attention out-proj + residual(value) + LayerNorm, fused in one kernel
    attn_norm = matmul_residual_layernorm(af, p["wo"], p["bo"], xf,
                                          p["ln_g"], p["ln_b"])

    # FFN + residual + (same, shared) LayerNorm; (M,4E) intermediate stays in VMEM
    out = ffn_residual_layernorm(attn_norm, p["w1"], p["b1"], p["w2"], p["b2"],
                                 p["ln_g"], p["ln_b"])
    return out.reshape(B, S, E)


def make_positional_encoding(seq_len, embed_dim):
    pos = jnp.arange(seq_len, dtype=jnp.float32)[:, None]
    i = jnp.arange(0, embed_dim, 2, dtype=jnp.float32)[None, :]
    angle = pos / jnp.power(10000.0, i / embed_dim)
    pe = jnp.zeros((seq_len, embed_dim), jnp.float32)
    pe = pe.at[:, 0::2].set(jnp.sin(angle))
    pe = pe.at[:, 1::2].set(jnp.cos(angle))
    return pe


def prepare_params(params):
    """One-time prep: stack QKV weights/biases and cast matmul weights to bf16
    (MXU-native). Done once at build time, NOT per forward call."""
    prepped = []
    for blk in params["blocks"]:
        prepped.append({
            "wqkv": jnp.stack([blk["wq"], blk["wk"], blk["wv"]],
                              axis=0).astype(jnp.bfloat16),          # (3, E, E)
            "bqkv": jnp.stack([blk["bq"], blk["bk"], blk["bv"]],
                              axis=0)[:, None, :],                   # (3, 1, E) f32
            "wo": blk["wo"].astype(jnp.bfloat16),
            "bo": blk["bo"],
            "ln_g": blk["ln_g"],
            "ln_b": blk["ln_b"],
            "w1": blk["w1"].astype(jnp.bfloat16),
            "b1": blk["b1"],
            "w2": blk["w2"].astype(jnp.bfloat16),
            "b2": blk["b2"],
        })
    return {"emb": params["emb"], "blocks": prepped}


def encoder_fwd(tokens, run_params, pe, heads):
    """tokens: (B, S) int32 -> (B, S, E) float32."""
    E = run_params["emb"].shape[1]
    # embedding gather + PE add: plain-JAX glue
    x = jnp.take(run_params["emb"], tokens, axis=0)
    x = x * jnp.sqrt(jnp.float32(E)) + pe[None, : tokens.shape[1], :]
    out = x
    for blk in run_params["blocks"]:
        out = encoder_block_fwd(out, blk, heads)
    return out


# ----------------------------------------------------------------------------
# Plain-JAX f32 reference (same math) for the correctness check
# ----------------------------------------------------------------------------
def _ref_block(x, p, heads):
    B, S, E = x.shape
    D = E // heads
    xf = x.reshape(B * S, E)

    def lin(t, w, b):
        return t @ w + b

    def split(t):
        return t.reshape(B, S, heads, D).transpose(0, 2, 1, 3)

    q = split(lin(xf, p["wq"], p["bq"]).reshape(B, S, E))
    k = split(lin(xf, p["wk"], p["bk"]).reshape(B, S, E))
    v = split(lin(xf, p["wv"], p["bv"]).reshape(B, S, E))
    s = jnp.einsum("bhqd,bhkd->bhqk", q, k) / math.sqrt(D)
    pr = jax.nn.softmax(s, axis=-1)
    a = jnp.einsum("bhqk,bhkd->bhqd", pr, v).transpose(0, 2, 1, 3).reshape(B * S, E)
    attn_out = lin(a, p["wo"], p["bo"])

    def ln(t):
        mu = t.mean(-1, keepdims=True)
        var = ((t - mu) ** 2).mean(-1, keepdims=True)
        return (t - mu) / jnp.sqrt(var + 1e-5) * p["ln_g"] + p["ln_b"]

    an = ln(attn_out + xf)
    h = lin(jnp.maximum(lin(an, p["w1"], p["b1"]), 0.0), p["w2"], p["b2"])
    return ln(h + an).reshape(B, S, E)


def _ref_encoder(tokens, params, pe, heads):
    E = params["emb"].shape[1]
    x = jnp.take(params["emb"], tokens, axis=0) * jnp.sqrt(jnp.float32(E))
    x = x + pe[None, : tokens.shape[1], :]
    for blk in params["blocks"]:
        x = _ref_block(x, blk, heads)
    return x


# ----------------------------------------------------------------------------
# Deterministic parameter init
# ----------------------------------------------------------------------------
def init_params(key, vocab_size, embed_dim, num_blocks, expansion_factor):
    keys = jax.random.split(key, 1 + num_blocks)
    params = {"emb": 0.02 * jax.random.normal(keys[0], (vocab_size, embed_dim),
                                              jnp.float32)}
    blocks = []
    hid = expansion_factor * embed_dim
    for b in range(num_blocks):
        ks = jax.random.split(keys[1 + b], 12)
        s = 1.0 / math.sqrt(embed_dim)
        blk = {
            "wq": s * jax.random.normal(ks[0], (embed_dim, embed_dim), jnp.float32),
            "bq": jnp.zeros((embed_dim,), jnp.float32),
            "wk": s * jax.random.normal(ks[1], (embed_dim, embed_dim), jnp.float32),
            "bk": jnp.zeros((embed_dim,), jnp.float32),
            "wv": s * jax.random.normal(ks[2], (embed_dim, embed_dim), jnp.float32),
            "bv": jnp.zeros((embed_dim,), jnp.float32),
            "wo": s * jax.random.normal(ks[3], (embed_dim, embed_dim), jnp.float32),
            "bo": 0.01 * jax.random.normal(ks[4], (embed_dim,), jnp.float32),
            "ln_g": jnp.ones((embed_dim,), jnp.float32),
            "ln_b": jnp.zeros((embed_dim,), jnp.float32),
            "w1": s * jax.random.normal(ks[5], (embed_dim, hid), jnp.float32),
            "b1": 0.01 * jax.random.normal(ks[6], (hid,), jnp.float32),
            "w2": (1.0 / math.sqrt(hid)) * jax.random.normal(ks[7], (hid, embed_dim),
                                                             jnp.float32),
            "b2": 0.01 * jax.random.normal(ks[8], (embed_dim,), jnp.float32),
        }
        blocks.append(blk)
    params["blocks"] = blocks
    return params


# ----------------------------------------------------------------------------
if __name__ == "__main__":
    # Small, module-consistent shapes
    BATCH, SEQ_LEN = 2, 8
    VOCAB, EMBED, HEADS, BLOCKS, EXPANSION = 50, 32, 4, 2, 4
    # TODO(synk): dropout layers are identity here (eval mode).

    key = jax.random.PRNGKey(0)
    k_tok, k_par = jax.random.split(key)
    tokens = jax.random.randint(k_tok, (BATCH, SEQ_LEN), 0, VOCAB, dtype=jnp.int32)
    params = init_params(k_par, VOCAB, EMBED, BLOCKS, EXPANSION)
    pe = make_positional_encoding(SEQ_LEN, EMBED)
    run_params = prepare_params(params)        # one-time QKV fuse + bf16 cast

    out = encoder_fwd(tokens, run_params, pe, HEADS)
    out = jax.block_until_ready(out)

    ref = _ref_encoder(tokens, params, pe, HEADS)
    assert out.shape == (BATCH, SEQ_LEN, EMBED)
    # bf16 MXU operands -> compare against the f32 reference at bf16-scale tol.
    assert jnp.allclose(out, ref, rtol=3e-2, atol=3e-2), "mismatch vs JAX reference"

    print("KERNEL_OK")
</pallas_src>

<mosaic_0001>
module attributes {stable_mosaic.version = 11 : i64} {
  func.func @_qkv_kernel(%arg0: i32, %arg1: i32, %arg2: i32, %arg3: memref<16x32xf32, #tpu.memory_space<vmem>>, %arg4: memref<1x32x32xbf16, #tpu.memory_space<vmem>>, %arg5: memref<1x1x32xf32, #tpu.memory_space<vmem>>, %arg6: memref<1x16x32xbf16, #tpu.memory_space<vmem>>, %arg7: memref<16x32xf32, #tpu.memory_space<vmem>>) attributes {dimension_semantics = [#tpu.dimension_semantics<parallel>, #tpu.dimension_semantics<parallel>, #tpu.dimension_semantics<arbitrary>], iteration_bounds = array<i64: 3, 1, 1>, scalar_prefetch = 0 : i64, scratch_operands = 1 : i64, tpu.core_type = #tpu.core_type<tc>, window_params = [{transform_indices = @transform_0, window_bounds = array<i64: 16, 32>}, {transform_indices = @transform_1, window_bounds = array<i64: 1, 32, 32>}, {transform_indices = @transform_2, window_bounds = array<i64: 1, 1, 32>}, {transform_indices = @transform_3, window_bounds = array<i64: 1, 16, 32>}]} {
    %c0_i32 = arith.constant 0 : i32
    %0 = arith.cmpi eq, %arg2, %c0_i32 : i32
    %1 = arith.extui %0 : i1 to i32
    %c0_i32_0 = arith.constant 0 : i32
    %2 = arith.cmpi ne, %1, %c0_i32_0 : i32
    scf.if %2 {
      %cst_11 = arith.constant 0.000000e+00 : f32
      %14 = vector.broadcast %cst_11 : f32 to vector<16x32xf32>
      %c0_12 = arith.constant 0 : index
      %c0_13 = arith.constant 0 : index
      %15 = vector.load %arg7[%c0_12, %c0_13] : memref<16x32xf32, #tpu.memory_space<vmem>>, vector<16x32xf32>
      tpu.vector_store %arg7[%c0_12, %c0_13], %14 {strides = array<i32>} : memref<16x32xf32, #tpu.memory_space<vmem>>, vector<16x32xf32>,
    } else {
    }
    %c0 = arith.constant 0 : index
    %c0_1 = arith.constant 0 : index
    %3 = vector.load %arg7[%c0, %c0_1] : memref<16x32xf32, #tpu.memory_space<vmem>>, vector<16x32xf32>
    %c0_2 = arith.constant 0 : index
    %c0_3 = arith.constant 0 : index
    %4 = vector.load %arg3[%c0_2, %c0_3] : memref<16x32xf32, #tpu.memory_space<vmem>>, vector<16x32xf32>
    %5 = arith.truncf %4 : vector<16x32xf32> to vector<16x32xbf16>
    %c0_4 = arith.constant 0 : index
    %c0_5 = arith.constant 0 : index
    %c0_6 = arith.constant 0 : index
    %6 = vector.load %arg4[%c0_4, %c0_5, %c0_6] : memref<1x32x32xbf16, #tpu.memory_space<vmem>>, vector<1x32x32xbf16>
    %7 = vector.shape_cast %6 : vector<1x32x32xbf16> to vector<32x32xbf16>
    %cst = arith.constant dense<0.000000e+00> : vector<16x32xf32>
    %8 = tpu.matmul %5, %7, %cst {dimension_numbers = #tpu.dot_dimension_numbers<[1], [0], [0], [1], [0, 0, 1, 1], [], []>} : vector<16x32xbf16>, vector<32x32xbf16>, vector<16x32xf32> -> vector<16x32xf32>
    %9 = arith.addf %3, %8 : vector<16x32xf32>
    %c0_7 = arith.constant 0 : index
    %c0_8 = arith.constant 0 : index
    %10 = vector.load %arg7[%c0_7, %c0_8] : memref<16x32xf32, #tpu.memory_space<vmem>>, vector<16x32xf32>
    tpu.vector_store %arg7[%c0_7, %c0_8], %9 {strides = array<i32>} : memref<16x32xf32, #tpu.memory_space<vmem>>, vector<16x32xf32>,
    %c0_i32_9 = arith.constant 0 : i32
    %11 = arith.cmpi eq, %arg2, %c0_i32_9 : i32
    %12 = arith.extui %11 : i1 to i32
    %c0_i32_10 = arith.constant 0 : i32
    %13 = arith.cmpi ne, %12, %c0_i32_10 : i32
    scf.if %13 {
      %c0_11 = arith.constant 0 : index
      %c0_12 = arith.constant 0 : index
      %14 = vector.load %arg7[%c0_11, %c0_12] : memref<16x32xf32, #tpu.memory_space<vmem>>, vector<16x32xf32>
      %c0_13 = arith.constant 0 : index
      %c0_14 = arith.constant 0 : index
      %c0_15 = arith.constant 0 : index
      %15 = vector.load %arg5[%c0_13, %c0_14, %c0_15] : memref<1x1x32xf32, #tpu.memory_space<vmem>>, vector<1x1x32xf32>
      %16 = vector.shape_cast %15 : vector<1x1x32xf32> to vector<1x32xf32>
      %17 = vector.broadcast %16 : vector<1x32xf32> to vector<16x32xf32>
      %18 = arith.addf %14, %17 : vector<16x32xf32>
      %19 = arith.truncf %18 : vector<16x32xf32> to vector<16x32xbf16>
      %c0_16 = arith.constant 0 : index
      %c0_17 = arith.constant 0 : index
      %c0_18 = arith.constant 0 : index
      %20 = vector.load %arg6[%c0_16, %c0_17, %c0_18] : memref<1x16x32xbf16, #tpu.memory_space<vmem>>, vector<1x16x32xbf16>
      %21 = vector.shape_cast %20 : vector<1x16x32xbf16> to vector<16x32xbf16>
      %22 = vector.shape_cast %19 : vector<16x32xbf16> to vector<1x16x32xbf16>
      tpu.vector_store %arg6[%c0_16, %c0_17, %c0_18], %22 {strides = array<i32>} : memref<1x16x32xbf16, #tpu.memory_space<vmem>>, vector<1x16x32xbf16>,
    } else {
    }
    return
  }
  func.func @transform_0(%arg0: i32, %arg1: i32, %arg2: i32) -> (i32, i32) {
    %c0_i32 = arith.constant 0 : i32
    return %arg1, %arg2 : i32, i32
  }
  func.func @transform_1(%arg0: i32, %arg1: i32, %arg2: i32) -> (i32, i32, i32) {
    %c0_i32 = arith.constant 0 : i32
    %c0_i32_0 = arith.constant 0 : i32
    return %arg0, %arg2, %c0_i32 : i32, i32, i32
  }
  func.func @transform_2(%arg0: i32, %arg1: i32, %arg2: i32) -> (i32, i32, i32) {
    %c0_i32 = arith.constant 0 : i32
    %c0_i32_0 = arith.constant 0 : i32
    %c0_i32_1 = arith.constant 0 : i32
    return %arg0, %c0_i32, %c0_i32_0 : i32, i32, i32
  }
  func.func @transform_3(%arg0: i32, %arg1: i32, %arg2: i32) -> (i32, i32, i32) {
    %c0_i32 = arith.constant 0 : i32
    %c0_i32_0 = arith.constant 0 : i32
    return %arg0, %arg1, %c0_i32 : i32, i32, i32
  }
}

</mosaic_0001>

<bundles_post_ra>
// kernel: tpu_custom_call.1
= control target key start
LH: loop header
LB: loop body
LE: loop exit
PB: predicated region body
PF: predicated region fallthrough
CT: control target
= control target key end

     0   :  { %s1113_s0 = inlined_call_operand.hbm [shape: f32[16,32], index: 0, kind: input, shape index: {}]   ;;  %s1114_s1 = inlined_call_operand.hbm [shape: bf16[3,32,32], index: 1, kind: input, shape index: {}]   ;;  %s1115_s2 = inlined_call_operand.hbm [shape: f32[3,1,32], index: 2, kind: input, shape index: {}]   ;;  %s1116_s3 = inlined_call_operand.hbm [shape: bf16[3,16,32], index: 3, kind: output, shape index: {}]  }
   0x1   :  { %1125 = sst [smem:[#allocation14_spill]] %s1114_s1 }
   0x2   :  { %8 = vsyncpa [#allocation4], 0 }
   0x3   :  { %9 = vsyncpa [#allocation7], 0 }
   0x4   :  { %11 = vsyncpa [#allocation7 + $0x1], 0 }
   0x5   :  { %12 = vsyncpa [#allocation5], 0 }
   0x6   :  { %14 = vsyncpa [#allocation5 + $0x1], 0  ;;  %s851_s12 = smov 0   ;;  %s853_s13 = smov 0  }
   0x7   :  { %s855_s14 = smov 0   ;;  %s857_s15 = smov 0  }
   0x8   :  { %s859_s16 = smov 0   ;;  %s861_s17 = smov 0  }
   0x9 LB: > { %s39_s18 = sadd.s32 1, %s813_s16  ;;  %s76_s19 = sadd.s32 1, %s805_s14  ;;  %s817_s17 = sphi %s861_s17, %s20_s17   ;;  %s813_s16 = sphi %s859_s16, %s1148_s16   ;;  %s809_s15 = sphi %s857_s15, %s1147_s15   ;;  %s805_s14 = sphi %s855_s14, %s1146_s14   ;;  %s801_s13 = sphi %s853_s13, %s1145_s13   ;;  %s797_s12 = sphi %s851_s12, %s1144_s12  }
   0xa   : > { %p41_p0 = scmp.ge.s32.totalorder %s39_s18, 3  ;;  %p83_p1 = scmp.ne.s32.totalorder %s805_s14, %s801_s13 }
   0xb   : > { %p84_p2 = scmp.eq.s32.totalorder %s817_s17, 0  ;;  %p581_p4 = scmp.lt.s32.totalorder %s817_s17, 3 }
   0xc   : > { %s1150_s18 = smov (%p41_p0, %s39_s18), 0  ;;  %s184_s21 = sand.u32 1, %s817_s17  }
   0xd   : > { %1126 = sst [smem:[#allocation13_spill]] %s1150_s18  ;;  %p85_p3 = por %p84_p2, %p83_p1 }
   0xe   : > { %s71_s20 = ssub.s32 %s813_s16, %s1150_s18  ;;  %s186_s22 = sand.u32 1, %s805_s14  }
   0xf   : > { %p74_p5 = scmp.eq.s32.totalorder %s71_s20, 0  ;;  %s540_s23 = sshll.u32 %s813_s16, 8 }
  0x10   : > { %s521_s25 = sshll.u32 %s186_s22, 4  ;;  %s1127_s1 = sld [smem:[#allocation14_spill]] }
  0x11   : > { %s898_s24 = scalar_select %p74_p5, %s805_s14, %s76_s19  }
  0x12   : > { %p907_p6 = pnand %p581_p4, %p85_p3  ;;  %s188_s30 = scalar_lea.vmem [#allocation6], %s521_s25 }
  0x13   : > { %s197_s4 = sshll.u32 %s188_s30, 4  ;;  %s913_s5 = scalar_lea.sflag [#allocation7], %s184_s21  ;;  %s911_s4 = int_to_ptr.vmem [resolvable:$true] %s197_s4 }
  0x14   : > { %s1128_s29 = scalar_select %p907_p6, 1, 0 }
  0x15   : > { %p1119_p8 = pneg %p907_p6 }
  0x16   : > { %s905_s28 = scalar_lea.hbm %s1127_s1, %s540_s23  ;;  %s648_s9 = scalar_lea.hbm %s1127_s1, 768 }
  0x17   : > { %s643_s6 = scalar_lea.hbm %s905_s28, 256  ;;  %p649_p11 = scmp.lt.u32.totalorder %s905_s28, %s1127_s1 }
  0x18   : > { %p644_p7 = scmp.ne.s32.totalorder %s905_s28, %s643_s6  ;;  %p650_p12 = scmp.lt.u32.totalorder %s648_s9, %s643_s6 }
  0x19   : > { %p652_p0 = scmp.lt.u32.totalorder %s643_s6, %s905_s28 }
  0x1a   : > { %p646_p9 = pnand %p1119_p8, %p644_p7  ;;  %p651_p13 = por %p650_p12, %p649_p11 }
  0x1c   : > { %p647_p10 = pneg %p646_p9  ;;  %p653_p2 = por %p652_p0, %p651_p13 }
  0x1e   : > { %p654_p3 = pnand %p653_p2, %p647_p10 }
  0x20   : > { %657 = shalt.err (!%p654_p3)
}
  0x21   : > { %s658_s19 = scalar_lea.vmem %s911_s4, 256  ;;  %s819_s20 = smov [#allocation6]  }
  0x22   : > { %p659_p4 = scmp.ne.s32.totalorder %s911_s4, %s658_s19  ;;  %s663_s21 = sshll.u32 %s819_s20, 4  ;;  %s664_s21 = int_to_ptr.vmem [resolvable:$false] %s663_s21 }
  0x23   : > { %s665_s23 = scalar_lea.vmem %s664_s21, 512  ;;  %p666_p9 = scmp.lt.s32.totalorder %s911_s4, %s664_s21 }
  0x24   : > { %p661_p5 = pnand %p659_p4, %p1119_p8  ;;  %p667_p11 = scmp.lt.s32.totalorder %s665_s23, %s658_s19 }
  0x26   : > { %p662_p7 = pneg %p661_p5  ;;  %p668_p12 = por %p667_p11, %p666_p9 }
  0x28   : > { %p669_p13 = pnand %p668_p12, %p662_p7 }
  0x2a   : > { %672 = shalt.err (!%p669_p13)
}
  0x2b   : > { %s820_s25 = smov 64   ;;  %s821_s26 = smov 4  }
  0x2c   : > { %572 = dma.hbm_to_vmem [thread:$0]  (!%p907_p6), %s905_s28, 256, %s911_s4, %s913_s5, %s820_s25, %s820_s25, %s821_s26  }
  0x2d   : > { %s942_s27 = sadd.s32 4294967295, %s817_s17   ;;  %s517_s30 = sadd.s32 4294967294, %s817_s17  }
  0x2e   : > { %p89_p10 = scmp.ne.s32.totalorder %s801_s13, %s797_s12  ;;  %p1118_p0 = scmp.eq.s32.totalorder %s942_s27, 0 }
  0x2f   : > { %p141_p2 = scmp.eq.s32.totalorder %s942_s27, 2  ;;  %p147_p3 = scmp.eq.s32.totalorder %s517_s30, 2 }
  0x30   : > { %p518_p4 = scmp.ge.s32.totalorder %s817_s17, 1  ;;  %p952_p5 = por %p1118_p0, %p89_p10 }
  0x31   : > { %p959_p7 = por %p141_p2, %p83_p1  ;;  %p963_p9 = por %p147_p3, %p89_p10 }
  0x32   : > { %s1129_s6 = scalar_select %p952_p5, 1, 0 }
  0x33   : > { %s1130_s28 = scalar_select %p959_p7, 1, 0 }
  0x34   : > { %s1131_s4 = scalar_select %p963_p9, 1, 0 }
  0x35   : > { %p154_p11 = scmp.lt.s32.totalorder %s817_s17, 4  ;;  %s822_s8 = smov [#allocation3]  }
  0x36   : > { %s170_s9 = sshll.u32 %s822_s8, 4  ;;  %s524_s10 = sshll.u32 %s813_s16, 4  ;;  %s972_s9 = int_to_ptr.vmem [resolvable:$true] %s170_s9 }
  0x37   : > { %p968_p12 = pnand %p518_p4, %p154_p11  ;;  %s986_s21 = scalar_lea.hbm %s1115_s2, %s524_s10 }
  0x38   : > { %s210_s23 = scalar_lea.vmem [#allocation8], %s186_s22  ;;  %s673_s8 = scalar_lea.hbm %s1113_s0, 256 }
  0x39   : > { %s1132_s7 = scalar_select %p968_p12, 1, 0 }
  0x3a   : > { %p565_p13 = pneg %p968_p12  ;;  %s217_s25 = sshll.u32 %s210_s23, 4  ;;  %s990_s25 = int_to_ptr.vmem [resolvable:$true] %s217_s25 }
  0x3b   : > { %p674_p10 = scmp.ne.s32.totalorder %s1113_s0, %s673_s8  ;;  %p680_p11 = scmp.lt.u32.totalorder %s673_s8, %s1113_s0 }
  0x3c   : > { %p979_p1 = pnand %p565_p13, %p1118_p0 }
  0x3e   : > { %p675_p2 = pneg %p979_p1 }
  0x40   : > { %p676_p3 = pnand %p675_p2, %p674_p10 }
  0x42   : > { %p677_p4 = pneg %p676_p3 }
  0x44   : > { %p682_p13 = pnand %p680_p11, %p677_p4 }
  0x46   : > { %685 = shalt.err (!%p682_p13)
}
  0x47   : > { %s686_s22 = scalar_lea.vmem %s972_s9, 256  ;;  %p694_p7 = scmp.lt.s32.totalorder %s972_s9, %s972_s9 }
  0x48   : > { %p687_p0 = scmp.ne.s32.totalorder %s972_s9, %s686_s22  ;;  %p695_p5 = scmp.lt.s32.totalorder %s686_s22, %s686_s22 }
  0x4a   : > { %p689_p8 = pnand %p687_p0, %p675_p2  ;;  %p696_p12 = por %p695_p5, %p694_p7 }
  0x4c   : > { %p690_p9 = pneg %p689_p8 }
  0x4e   : > { %p697_p6 = pnand %p696_p12, %p690_p9 }
  0x50   : > { %700 = shalt.err (!%p697_p6)
}
  0x51   : > { %s823_s1 = smov 128   ;;  %s824_s18 = smov 8  }
  0x52   : > { %568 = dma.hbm_to_vmem [thread:$0]  (!%p979_p1), %s1113_s0, 256, %s972_s9, [#allocation4], %s823_s1, %s823_s1, %s824_s18  }
  0x53   : > { %s701_s26 = scalar_lea.hbm %s986_s21, 16  ;;  %p1134_p0 = scmp.ne.s32.totalorder %s1128_s29, 0 }
  0x54   : > { %p702_p8 = scmp.ne.s32.totalorder %s986_s21, %s701_s26  ;;  %s706_s19 = scalar_lea.hbm %s1115_s2, 48 }
  0x55   : > { %p1135_p5 = pneg %p1134_p0  ;;  %p707_p9 = scmp.lt.u32.totalorder %s986_s21, %s1115_s2 }
  0x56   : > { %p708_p12 = scmp.lt.u32.totalorder %s706_s19, %s701_s26  ;;  %p710_p2 = scmp.lt.u32.totalorder %s701_s26, %s986_s21 }
  0x57   : > { %p704_p7 = pnand %p702_p8, %p1135_p5 }
  0x58   : > { %p709_p10 = por %p708_p12, %p707_p9 }
  0x59   : > { %p705_p6 = pneg %p704_p7 }
  0x5a   : > { %p711_p3 = por %p710_p2, %p709_p10 }
  0x5c   : > { %p712_p4 = pnand %p711_p3, %p705_p6 }
  0x5e   : > { %715 = shalt.err (!%p712_p4)
}
  0x5f   : > { %s716_s9 = scalar_lea.vmem %s990_s25, 16  ;;  %p1136_p11 = pmov %p1135_p5 }
  0x60   : > { %p717_p1 = scmp.ne.s32.totalorder %s990_s25, %s716_s9  ;;  %s825_s11 = smov [#allocation8]  }
  0x61   : > { %s721_s1 = sshll.u32 %s825_s11, 4  ;;  %s722_s1 = int_to_ptr.vmem [resolvable:$false] %s721_s1 }
  0x62   : > { %p719_p13 = pnand %p717_p1, %p1136_p11  ;;  %s723_s18 = scalar_lea.vmem %s722_s1, 32 }
  0x63   : > { %p724_p5 = scmp.lt.s32.totalorder %s990_s25, %s722_s1  ;;  %p725_p7 = scmp.lt.s32.totalorder %s723_s18, %s716_s9 }
  0x64   : > { %p720_p8 = pneg %p719_p13 }
  0x65   : > { %p726_p9 = por %p725_p7, %p724_p5 }
  0x67   : > { %p727_p12 = pnand %p726_p9, %p720_p8 }
  0x69   : > { %730 = shalt.err (!%p727_p12)
}
  0x6a   : > { %575 = dma.hbm_to_vmem [thread:$0]  (!%p1134_p0), %s986_s21, 16, %s990_s25, %s913_s5  }
  0x6b   : > { %p1137_p6 = scmp.ne.s32.totalorder %s1132_s7, 0 }
  0x6c   : > { %p1138_p10 = scmp.eq.s32.totalorder (!%p1137_p6), %s942_s27, 0 }
  0x6d   : > { %226 = sbr.rel (%p1137_p6) target bundleno = 374 (0x176), region = 32 }
  0x74   : > { %784 = dma.done.wait (%p1138_p10), [#allocation4], 256   ;;  %p1139_p2 = pmov %p1138_p10 }
  0x75   : > { %s232_s20 = sand.u32 1, %s942_s27   ;;  %s1045_s23 = sand.u32 1, %s801_s13  }
  0x76   : > { %786 = vsyncadd (%p1139_p2), [#allocation4], 4294967040  ;;  %s527_s29 = sshll.u32 %s1045_s23, 4  ;;  %s233_s26 = scalar_lea.sflag [#allocation7], %s232_s20 }
  0x77   : > { %s236_s30 = scalar_lea.vmem [#allocation6], %s527_s29  ;;  %p1140_p0 = scmp.ne.s32.totalorder %s1129_s6, 0 }
  0x79   : > { %788 = dma.done.wait (%p1140_p0), %s233_s26, 272  }
  0x7a   : > { %790 = vsyncadd (%p1140_p0), %s233_s26, 4294967024  ;;  %vm279_vm0 = vcmask 261120   ;;  %v826_v0 = vmov 0.0   ;;  %vm827_vm1 = vmmov 0   ;;  %v641_v1 = vld [vmem:[%s236_s30] sm:$0xff]   ;;  %v642_v2 = vld [vmem:[%s236_s30 + $0x8] sm:$0xff]  }
  0x7b   : > { %547 = vmatprep.subr.bf16.mxu0 %v826_v0  ;;  %551 = vmatprep.mubr.msk.bf16.mxu0 %vm827_vm1, %v826_v0  ;;  %280 = vst.msk [vmem:[#allocation2] sm:$0xff] %vm279_vm0, %v826_v0  ;;  %281 = vst.msk [vmem:[#allocation2 + $0x8] sm:$0xff] %vm279_vm0, %v826_v0  ;;  %v284_v3 = vld [vmem:[#allocation3] sm:$0xff]  ;;  %v285_v4 = vld [vmem:[#allocation3 + $0x8] sm:$0xff]  ;;  %s528_s5 = sshll.u32 %s1045_s23, 3  ;;  %s244_s27 = scalar_lea.vmem [#allocation8], %s1045_s23 }
  0x7c   : > { %548 = vmatpush3.bf16.msra.mxu0 %v641_v1  ;;  %v286_v5 = vpack.c.bf16 %v285_v4, %v284_v3  ;;  %v532_v14 = vld [vmem:[%s244_s27] ss:$0 sm:$0xff]  ;;  %s543_s6 = sshll.u32 %s809_s15, 7  ;;  %s270_s7 = scalar_lea.vmem [#allocation9], %s528_s5  ;;  %vm374_vm2 = vcmask 257024  }
  0x7d   : > { %549 = vmatprep.subr.bf16.mxu0 %v826_v0  ;;  %s393_s21 = sshll.u32 %s270_s7, 4  ;;  %s1063_s19 = scalar_lea.hbm %s1116_s3, %s543_s6  ;;  %s1065_s21 = int_to_ptr.vmem [resolvable:$true] %s393_s21 }
  0x7e   : > { %s378_s15 = scalar_lea.sflag [#allocation5], %s1045_s23  ;;  %s731_s10 = scalar_lea.vmem %s1065_s21, 128 }
  0x7f   : > { %p732_p3 = scmp.ne.s32.totalorder %s1065_s21, %s731_s10  ;;  %p1141_p4 = scmp.ne.s32.totalorder %s1130_s28, 0 }
  0x80   : > { %550 = vmatpush3.bf16.msra.mxu0 %v642_v2  ;;  %s828_s22 = smov [#allocation9]  }
  0x81   : > { %p733_p1 = pnand %p732_p3, %p1141_p4  ;;  %s735_s9 = sshll.u32 %s828_s22, 4  ;;  %s736_s9 = int_to_ptr.vmem [resolvable:$false] %s735_s9 }
  0x82   : > { %v282_v6 = vld [vmem:[#allocation2] sm:$0xff]  ;;  %v283_v8 = vld [vmem:[#allocation2 + $0x8] sm:$0xff]  ;;  %s737_s11 = scalar_lea.vmem %s736_s9, 256  ;;  %p738_p13 = scmp.lt.s32.totalorder %s1065_s21, %s736_s9 }
  0x83   : > { %552 = vmatmul.mubr.msk.bf16.vlgmr.msra.gmra.mrb[0].mxu0 %vm279_vm0, %v286_v5  ;;  %p734_p11 = pneg %p733_p1  ;;  %p739_p8 = scmp.lt.s32.totalorder %s737_s11, %s731_s10 }
  0x85   : > { %p740_p5 = por %p739_p8, %p738_p13 }
  0x87   : > { %p741_p7 = pnand %p740_p5, %p734_p11 }
 0x156   : > { %v341_v7 = vpop.f32.mrb[0].mxu0 }
 0x157   : > { %v348_v9 = vadd.f32 %v341_v7, %v282_v6  ;;  %v553_v10 = vpop.f32.mrb[1].mxu0 }
 0x158   : > { %v344_v11 = vpop.f32.mrb[2].mxu0 }
 0x159   : > { %350 = vst.msk [vmem:[#allocation2] sm:$0xff] %vm279_vm0, %v348_v9  ;;  %v349_v12 = vadd.f32 %v344_v11, %v283_v8  ;;  %v554_v13 = vpop.f32.mrb[3].mxu0 }
 0x15b   : > { %351 = vst.msk [vmem:[#allocation2 + $0x8] sm:$0xff] %vm279_vm0, %v349_v12 }
 0x160   : > { %v355_v15 = vld [vmem:[#allocation2] sm:$0xff] }
 0x161   : > { %v364_v16 = vadd.f32 %v532_v14, %v355_v15 }
 0x162   : > { %v356_v17 = vld [vmem:[#allocation2 + $0x8] sm:$0xff] }
 0x163   : > { %v365_v18 = vadd.f32 %v532_v14, %v356_v17  ;;  %v541_v19 = vpack.c.bf16 %v364_v16, %v364_v16 }
 0x165   : > { %v542_v20 = vpack.c.bf16 %v365_v18, %v365_v18  ;;  %375 = vst.msk [vmem:[%s270_s7] sm:$0xf] %vm374_vm2, %v541_v19 }
 0x167   : > { %376 = vst.msk [vmem:[%s270_s7 + $0x4] sm:$0xf] %vm374_vm2, %v542_v20 }
 0x168   : > { %744 = shalt.err (!%p741_p7)
}
 0x169   : > { %s745_s1 = scalar_lea.hbm %s1063_s19, 128  ;;  %s749_s29 = scalar_lea.hbm %s1116_s3, 384 }
 0x16a   : > { %p746_p9 = scmp.ne.s32.totalorder %s1063_s19, %s745_s1  ;;  %p750_p10 = scmp.lt.u32.totalorder %s1063_s19, %s1116_s3 }
 0x16b   : > { %p751_p2 = scmp.lt.u32.totalorder %s749_s29, %s745_s1  ;;  %p753_p3 = scmp.lt.u32.totalorder %s745_s1, %s1063_s19 }
 0x16c   : > { %p747_p12 = pnand %p746_p9, %p1141_p4 }
 0x16d   : > { %p752_p0 = por %p751_p2, %p750_p10 }
 0x16e   : > { %p748_p6 = pneg %p747_p12 }
 0x16f   : > { %p754_p1 = por %p753_p3, %p752_p0 }
 0x171   : > { %p755_p11 = pnand %p754_p1, %p748_p6 }
 0x173   : > { %758 = shalt.err (!%p755_p11)
}
 0x174   : > { %s829_s5 = smov 64   ;;  %s830_s27 = smov 4  }
 0x175   : > { %563 = dma.vmem_to_hbm [thread:$0]  (%p1141_p4), %s1065_s21, 128, %s1063_s19, %s378_s15, %s829_s5, %s829_s5, %s830_s27  }
 0x176 PF: > { %p583_p13 = scmp.ge.s32.totalorder %s817_s17, 2  ;;  %s408_s6 = sand.u32 1, %s797_s12  }
 0x177   : > { %p1142_p8 = scmp.ne.s32.totalorder %s1131_s4, 0  ;;  %s409_s7 = scalar_lea.sflag [#allocation5], %s408_s6 }
 0x179   : > { %p577_p5 = pnand %p583_p13, %p1142_p8 }
 0x17b   : > { %792 = dma.done.wait (!%p577_p5), %s409_s7, 128  }
 0x17c   : > { %794 = vsyncadd (!%p577_p5), %s409_s7, 4294967168  ;;  %s20_s17 = sadd.s32 1, %s817_s17   ;;  %s1143_s28 = sld [smem:[#allocation13_spill]] }
 0x17d   : > { %p17_p7 = scmp.ge.s32.totalorder %s20_s17, 5   ;;  %s1144_s12 = smov %s801_s13 }
 0x17e   : > { %s1145_s13 = smov %s805_s14  ;;  %s1146_s14 = smov %s898_s24 }
 0x17f   : > { %s1147_s15 = smov %s813_s16  ;;  %19 = sbr.rel (!%p17_p7) target bundleno = 9 (0x9), region = 102 }
 0x182   : > { %s1148_s16 = smov %s1143_s28 }
 0x186   :  { %414 = vsyncpa [#allocation4], 1 }
 0x187   :  { %416 = vsyncpa [#allocation4 + $0x1], 1 }
 0x188   :  { %417 = vsyncpa [#allocation7], 1 }
 0x189   :  { %419 = vsyncpa [#allocation7 + $0x1], 1 }
 0x18a   :  { %420 = vsyncpa [#allocation5], 1 }
 0x18b   :  { %422 = vsyncpa [#allocation5 + $0x1], 1 }

</bundles_post_ra>
